<compile_context>
chip_gen: v6e
topology: v6e:2x2x1
jax: 0.10.0
libtpu: 0.0.40
codegen_flags: <defaults>
</compile_context>

<pallas_src>
import functools

import jax
import jax.numpy as jnp
from jax.experimental import pallas as pl
from jax.experimental.pallas import tpu as pltpu


def _round_up(x, m):
    return (x + m - 1) // m * m


def _mlp_kernel(x_ref, w1_ref, b1_ref, w2_ref, b2_ref, w3_ref, b3_ref, o_ref):
    cdt = w1_ref.dtype
    x = x_ref[...].astype(cdt)                              # (3, TB), batch on lanes

    # fc1 + ReLU: (H1, 3) @ (3, TB) on the MXU (K=3 is zero-padded by Mosaic),
    # f32 accumulation; bias + ReLU are the only VPU work.
    h = jnp.dot(w1_ref[...], x, preferred_element_type=jnp.float32)
    h = jnp.maximum(h + b1_ref[...], 0.0)                   # (H1, TB) f32

    # fc2 + ReLU: (H2, H1) @ (H1, TB) on the MXU.
    h = jnp.dot(w2_ref[...], h.astype(cdt), preferred_element_type=jnp.float32)
    h = jnp.maximum(h + b2_ref[...], 0.0)                   # (H2, TB) f32

    # fc3 (no activation): (3, H2) @ (H2, TB) -> (3, TB).
    out = jnp.dot(w3_ref[...], h.astype(cdt), preferred_element_type=jnp.float32)
    o_ref[...] = (out + b3_ref[...]).astype(o_ref.dtype)


def _pick_tile(B, tile_b):
    """Pick a lane tile: multiple of 128, and small enough that realistic
    batches produce >= 2 grid steps (so both v7x TensorCores get work)."""
    tb = _round_up(max(int(tile_b), 128), 128)        # defensive 128-lane rounding
    tb = min(tb, _round_up(pl.cdiv(B, 2), 128))       # >= 2 steps when batch allows
    tb = max(tb, 128)
    Bp = _round_up(B, tb)
    return tb, Bp


def _run_fm(x, params, tb, compute_dtype):
    """Core pallas_call. x: (3, Bp) with Bp % tb == 0. Returns (3, Bp)."""
    Bp = x.shape[1]
    h1 = params["w1"].shape[0]
    h2 = params["w2"].shape[0]

    w1 = params["w1"].astype(compute_dtype)
    w2 = params["w2"].astype(compute_dtype)
    w3 = params["w3"].astype(compute_dtype)
    # Biases as (out, 1) f32 columns -> per-sublane broadcast in the kernel.
    b1 = params["b1"].reshape(h1, 1).astype(jnp.float32)
    b2 = params["b2"].reshape(h2, 1).astype(jnp.float32)
    b3 = params["b3"].reshape(3, 1).astype(jnp.float32)

    grid = (Bp // tb,)
    itemsize = jnp.dtype(x.dtype).itemsize
    w_itemsize = jnp.dtype(compute_dtype).itemsize
    flops = 2 * Bp * (3 * h1 + h1 * h2 + h2 * 3)
    bytes_accessed = (2 * Bp * 3 * itemsize                       # x + out
                      + (h1 * 3 + h2 * h1 + 3 * h2) * w_itemsize  # weights
                      + (h1 + h2 + 3) * 4)                        # biases

    return pl.pallas_call(
        _mlp_kernel,
        out_shape=jax.ShapeDtypeStruct((3, Bp), x.dtype),
        grid_spec=pltpu.PrefetchScalarGridSpec(
            num_scalar_prefetch=0,
            grid=grid,
            in_specs=[
                pl.BlockSpec((3, tb), lambda i: (0, i)),    # x : tiled over batch lanes
                pl.BlockSpec((h1, 3), lambda i: (0, 0)),    # w1: resident
                pl.BlockSpec((h1, 1), lambda i: (0, 0)),    # b1
                pl.BlockSpec((h2, h1), lambda i: (0, 0)),   # w2
                pl.BlockSpec((h2, 1), lambda i: (0, 0)),    # b2
                pl.BlockSpec((3, h2), lambda i: (0, 0)),    # w3
                pl.BlockSpec((3, 1), lambda i: (0, 0)),     # b3
            ],
            out_specs=pl.BlockSpec((3, tb), lambda i: (0, i)),
        ),
        compiler_params=pltpu.CompilerParams(
            dimension_semantics=("parallel",),   # batch axis shards across TCs (v7x)
            vmem_limit_bytes=32 * 1024 * 1024,   # > v5e's 16 MiB default, < v7x's 64 MiB physical
        ),
        cost_estimate=pl.CostEstimate(
            flops=flops, transcendentals=0, bytes_accessed=bytes_accessed),
    )(x, w1, b1, w2, b2, w3, b3)


@functools.partial(jax.jit, static_argnames=("tile_b", "compute_dtype"))
def parameter_calibration_forward(p, params, *, tile_b=8192,
                                  compute_dtype=jnp.float32):
    """PyTorch-compatible entry: p (B, 3) = [theta_a, d, theta_p] per row,
    returns calibrated parameters (B, 3).

    params: PyTorch-layout weights
      w1 (h1, 3), b1 (h1,), w2 (h2, h1), b2 (h2,), w3 (3, h2), b3 (3,)

    Wrapper cost: one fused pad+transpose materialization on the input and one
    slice+transpose on the output. Layout-flexible callers should use
    `parameter_calibration_forward_fm` to avoid both.
    """
    B, in_dim = p.shape
    assert in_dim == 3
    tb, Bp = _pick_tile(B, tile_b)
    # Single input materialization: the pad fuses into the transpose.
    x = jnp.pad(p, ((0, Bp - B), (0, 0))).T if Bp != B else p.T    # (3, Bp)
    out_fm = _run_fm(x, params, tb, compute_dtype)
    return out_fm[:, :B].T


@functools.partial(jax.jit, static_argnames=("tile_b", "compute_dtype"))
def parameter_calibration_forward_fm(x, params, *, tile_b=8192,
                                     compute_dtype=jnp.float32):
    """Feature-major entry: x (3, B) -> (3, B). Zero wrapper-side copies when
    B is a multiple of the chosen tile (always a multiple of 128); otherwise
    the batch is padded (and sliced back) transparently."""
    assert x.shape[0] == 3
    B = x.shape[1]
    tb, Bp = _pick_tile(B, tile_b)
    if Bp != B:
        x = jnp.pad(x, ((0, 0), (0, Bp - B)))
    out = _run_fm(x, params, tb, compute_dtype)
    return out[:, :B] if Bp != B else out


def init_params(hidden1, hidden2, key):
    """PyTorch nn.Linear-style init: U(-1/sqrt(fan_in), 1/sqrt(fan_in)).
    Weights stored in PyTorch layout (out_features, in_features)."""
    keys = jax.random.split(key, 6)

    def linear(kw, kb, fan_in, fan_out):
        bound = 1.0 / jnp.sqrt(fan_in)
        w = jax.random.uniform(kw, (fan_out, fan_in), jnp.float32, -bound, bound)
        b = jax.random.uniform(kb, (fan_out,), jnp.float32, -bound, bound)
        return w, b

    w1, b1 = linear(keys[0], keys[1], 3, hidden1)
    w2, b2 = linear(keys[2], keys[3], hidden1, hidden2)
    w3, b3 = linear(keys[4], keys[5], hidden2, 3)
    return {"w1": w1, "b1": b1, "w2": w2, "b2": b2, "w3": w3, "b3": b3}


def reference_forward(p, params):
    h1 = jnp.maximum(p @ params["w1"].T + params["b1"], 0.0)
    h2 = jnp.maximum(h1 @ params["w2"].T + params["b2"], 0.0)
    return h2 @ params["w3"].T + params["b3"]


if __name__ == "__main__":
    key = jax.random.PRNGKey(0)
    k_params, k_x1, k_x2 = jax.random.split(key, 3)

    hidden1, hidden2 = 32, 32
    params = init_params(hidden1, hidden2, k_params)

    # Small case (matches the module's intended use): batch = 8, p = [theta_a, d, theta_p].
    p_small = jax.random.normal(k_x1, (8, 3), jnp.float32)
    out_small = jax.block_until_ready(parameter_calibration_forward(p_small, params))
    ref_small = reference_forward(p_small, params)
    assert out_small.shape == (8, 3)
    assert jnp.allclose(out_small, ref_small, atol=1e-5, rtol=1e-5), "mismatch (small batch)"

    # Ragged multi-tile case: exercises tile rounding, padding, multi-step grid.
    p_big = jax.random.normal(k_x2, (300, 3), jnp.float32)
    out_big = jax.block_until_ready(
        parameter_calibration_forward(p_big, params, tile_b=128))
    ref_big = reference_forward(p_big, params)
    assert out_big.shape == (300, 3)
    assert jnp.allclose(out_big, ref_big, atol=1e-5, rtol=1e-5), "mismatch (ragged batch)"

    # Feature-major path (no wrapper transposes).
    x_fm = p_big.T
    out_fm = jax.block_until_ready(parameter_calibration_forward_fm(x_fm, params))
    assert out_fm.shape == (3, 300)
    assert jnp.allclose(out_fm.T, ref_big, atol=1e-5, rtol=1e-5), "mismatch (feature-major)"

    # bf16 compute path (recommended on v6e/v7x; keep f32 on v5e): loose tolerance.
    out_bf16 = jax.block_until_ready(
        parameter_calibration_forward(p_small, params, compute_dtype=jnp.bfloat16))
    assert jnp.allclose(out_bf16, ref_small, atol=3e-2, rtol=5e-2), "mismatch (bf16)"

    # TODO(synk): for hot training loops, sweep tile_b in 8192..32768 per chip generation.
    print("KERNEL_OK")
</pallas_src>

<mosaic_0001>
module attributes {stable_mosaic.version = 11 : i64} {
  func.func @_mlp_kernel(%arg0: i32, %arg1: memref<3x128xf32, #tpu.memory_space<vmem>>, %arg2: memref<32x3xf32, #tpu.memory_space<vmem>>, %arg3: memref<32x1xf32, #tpu.memory_space<vmem>>, %arg4: memref<32x32xf32, #tpu.memory_space<vmem>>, %arg5: memref<32x1xf32, #tpu.memory_space<vmem>>, %arg6: memref<3x32xf32, #tpu.memory_space<vmem>>, %arg7: memref<3x1xf32, #tpu.memory_space<vmem>>, %arg8: memref<3x128xf32, #tpu.memory_space<vmem>>) attributes {dimension_semantics = [#tpu.dimension_semantics<parallel>], iteration_bounds = array<i64: 1>, scalar_prefetch = 0 : i64, scratch_operands = 0 : i64, tpu.core_type = #tpu.core_type<tc>, window_params = [{transform_indices = @transform_0, window_bounds = array<i64: 3, 128>}, {pipeline_mode = #tpu.pipeline_mode<synchronous>, transform_indices = @transform_1, window_bounds = array<i64: 32, 3>}, {pipeline_mode = #tpu.pipeline_mode<synchronous>, transform_indices = @transform_2, window_bounds = array<i64: 32, 1>}, {pipeline_mode = #tpu.pipeline_mode<synchronous>, transform_indices = @transform_3, window_bounds = array<i64: 32, 32>}, {pipeline_mode = #tpu.pipeline_mode<synchronous>, transform_indices = @transform_4, window_bounds = array<i64: 32, 1>}, {pipeline_mode = #tpu.pipeline_mode<synchronous>, transform_indices = @transform_5, window_bounds = array<i64: 3, 32>}, {pipeline_mode = #tpu.pipeline_mode<synchronous>, transform_indices = @transform_6, window_bounds = array<i64: 3, 1>}, {transform_indices = @transform_7, window_bounds = array<i64: 3, 128>}]} {
    %c0 = arith.constant 0 : index
    %c0_0 = arith.constant 0 : index
    %0 = vector.load %arg1[%c0, %c0_0] : memref<3x128xf32, #tpu.memory_space<vmem>>, vector<3x128xf32>
    %c0_1 = arith.constant 0 : index
    %c0_2 = arith.constant 0 : index
    %1 = vector.load %arg2[%c0_1, %c0_2] : memref<32x3xf32, #tpu.memory_space<vmem>>, vector<32x3xf32>
    %cst = arith.constant dense<0.000000e+00> : vector<32x128xf32>
    %2 = tpu.matmul %1, %0, %cst {dimension_numbers = #tpu.dot_dimension_numbers<[1], [0], [0], [1], [0, 0, 1, 1], [], []>} : vector<32x3xf32>, vector<3x128xf32>, vector<32x128xf32> -> vector<32x128xf32>
    %c0_3 = arith.constant 0 : index
    %c0_4 = arith.constant 0 : index
    %3 = vector.load %arg3[%c0_3, %c0_4] : memref<32x1xf32, #tpu.memory_space<vmem>>, vector<32x1xf32>
    %4 = vector.broadcast %3 : vector<32x1xf32> to vector<32x128xf32>
    %5 = arith.addf %2, %4 : vector<32x128xf32>
    %cst_5 = arith.constant 0.000000e+00 : f32
    %6 = vector.broadcast %cst_5 : f32 to vector<32x128xf32>
    %7 = arith.maximumf %5, %6 : vector<32x128xf32>
    %c0_6 = arith.constant 0 : index
    %c0_7 = arith.constant 0 : index
    %8 = vector.load %arg4[%c0_6, %c0_7] : memref<32x32xf32, #tpu.memory_space<vmem>>, vector<32x32xf32>
    %cst_8 = arith.constant dense<0.000000e+00> : vector<32x128xf32>
    %9 = tpu.matmul %8, %7, %cst_8 {dimension_numbers = #tpu.dot_dimension_numbers<[1], [0], [0], [1], [0, 0, 1, 1], [], []>} : vector<32x32xf32>, vector<32x128xf32>, vector<32x128xf32> -> vector<32x128xf32>
    %c0_9 = arith.constant 0 : index
    %c0_10 = arith.constant 0 : index
    %10 = vector.load %arg5[%c0_9, %c0_10] : memref<32x1xf32, #tpu.memory_space<vmem>>, vector<32x1xf32>
    %11 = vector.broadcast %10 : vector<32x1xf32> to vector<32x128xf32>
    %12 = arith.addf %9, %11 : vector<32x128xf32>
    %cst_11 = arith.constant 0.000000e+00 : f32
    %13 = vector.broadcast %cst_11 : f32 to vector<32x128xf32>
    %14 = arith.maximumf %12, %13 : vector<32x128xf32>
    %c0_12 = arith.constant 0 : index
    %c0_13 = arith.constant 0 : index
    %15 = vector.load %arg6[%c0_12, %c0_13] : memref<3x32xf32, #tpu.memory_space<vmem>>, vector<3x32xf32>
    %cst_14 = arith.constant dense<0.000000e+00> : vector<3x128xf32>
    %16 = tpu.matmul %15, %14, %cst_14 {dimension_numbers = #tpu.dot_dimension_numbers<[1], [0], [0], [1], [0, 0, 1, 1], [], []>} : vector<3x32xf32>, vector<32x128xf32>, vector<3x128xf32> -> vector<3x128xf32>
    %c0_15 = arith.constant 0 : index
    %c0_16 = arith.constant 0 : index
    %17 = vector.load %arg7[%c0_15, %c0_16] : memref<3x1xf32, #tpu.memory_space<vmem>>, vector<3x1xf32>
    %18 = vector.broadcast %17 : vector<3x1xf32> to vector<3x128xf32>
    %19 = arith.addf %16, %18 : vector<3x128xf32>
    %c0_17 = arith.constant 0 : index
    %c0_18 = arith.constant 0 : index
    %20 = vector.load %arg8[%c0_17, %c0_18] : memref<3x128xf32, #tpu.memory_space<vmem>>, vector<3x128xf32>
    tpu.vector_store %arg8[%c0_17, %c0_18], %19 {strides = array<i32>} : memref<3x128xf32, #tpu.memory_space<vmem>>, vector<3x128xf32>,
    return
  }
  func.func @transform_0(%arg0: i32) -> (i32, i32) {
    %c0_i32 = arith.constant 0 : i32
    %c0_i32_0 = arith.constant 0 : i32
    return %c0_i32, %arg0 : i32, i32
  }
  func.func @transform_1(%arg0: i32) -> (i32, i32) {
    %c0_i32 = arith.constant 0 : i32
    %c0_i32_0 = arith.constant 0 : i32
    %c0_i32_1 = arith.constant 0 : i32
    return %c0_i32, %c0_i32_0 : i32, i32
  }
  func.func @transform_2(%arg0: i32) -> (i32, i32) {
    %c0_i32 = arith.constant 0 : i32
    %c0_i32_0 = arith.constant 0 : i32
    %c0_i32_1 = arith.constant 0 : i32
    return %c0_i32, %c0_i32_0 : i32, i32
  }
  func.func @transform_3(%arg0: i32) -> (i32, i32) {
    %c0_i32 = arith.constant 0 : i32
    %c0_i32_0 = arith.constant 0 : i32
    %c0_i32_1 = arith.constant 0 : i32
    return %c0_i32, %c0_i32_0 : i32, i32
  }
  func.func @transform_4(%arg0: i32) -> (i32, i32) {
    %c0_i32 = arith.constant 0 : i32
    %c0_i32_0 = arith.constant 0 : i32
    %c0_i32_1 = arith.constant 0 : i32
    return %c0_i32, %c0_i32_0 : i32, i32
  }
  func.func @transform_5(%arg0: i32) -> (i32, i32) {
    %c0_i32 = arith.constant 0 : i32
    %c0_i32_0 = arith.constant 0 : i32
    %c0_i32_1 = arith.constant 0 : i32
    return %c0_i32, %c0_i32_0 : i32, i32
  }
  func.func @transform_6(%arg0: i32) -> (i32, i32) {
    %c0_i32 = arith.constant 0 : i32
    %c0_i32_0 = arith.constant 0 : i32
    %c0_i32_1 = arith.constant 0 : i32
    return %c0_i32, %c0_i32_0 : i32, i32
  }
  func.func @transform_7(%arg0: i32) -> (i32, i32) {
    %c0_i32 = arith.constant 0 : i32
    %c0_i32_0 = arith.constant 0 : i32
    return %c0_i32, %arg0 : i32, i32
  }
}

</mosaic_0001>

<bundles_post_ra>
// kernel: parameter_calibration_forward.1
= control target key start
LH: loop header
LB: loop body
LE: loop exit
PB: predicated region body
PF: predicated region fallthrough
CT: control target
= control target key end

     0   :  { %vm68_vm0 = vcmask 1042432   ;;  %vm55_vm1 = vcmask 23552   ;;  %v442_v3 = vmov 0   ;;  %vm189_vm2 = vcmask 261120   ;;  %s554_s0 = inlined_call_operand.vmem [shape: f32[3,128], index: 0, kind: input, shape index: {}]   ;;  %s555_s1 = inlined_call_operand.vmem [shape: f32[32,3], index: 1, kind: input, shape index: {}]   ;;  %s556_s2 = inlined_call_operand.vmem [shape: f32[32,1], index: 2, kind: input, shape index: {}]   ;;  %s557_s4 = inlined_call_operand.vmem [shape: f32[32,1], index: 4, kind: input, shape index: {}]   ;;  %s558_s6 = inlined_call_operand.vmem [shape: f32[3,1], index: 6, kind: input, shape index: {}]   ;;  %s559_s3 = inlined_call_operand.vmem [shape: f32[32,32], index: 3, kind: input, shape index: {}]   ;;  %s560_s5 = inlined_call_operand.vmem [shape: f32[3,32], index: 5, kind: input, shape index: {}]   ;;  %s561_s7 = inlined_call_operand.vmem [shape: f32[3,128], index: 7, kind: output, shape index: {}]  }
   0x1   :  { %v26_v0 = vld [vmem:[%s554_s0] sm:$0x7]  ;;  %v28_v2 = vld [vmem:[%s555_s1 + $0x8] sm:$0xff]  ;;  %440 = vset.pattern.permute.xlu0 %v442_v3  ;;  %441 = vset.pattern.permute.xlu1 %v442_v3  ;;  %v29_v4 = vld [vmem:[%s555_s1 + $0x10] sm:$0xff]  ;;  %v443_v35 = vmov 0.0   ;;  %vm444_vm3 = vmmov 0  }
   0x2   :  { %v27_v1 = vld [vmem:[%s555_s1] sm:$0xff]  ;;  %404 = vmatprep.subr.msk.mxu0 %vm68_vm0, %v26_v0  ;;  %v34_v5 = vld [vmem:[%s556_s2 + $0x18] sm:$0xff]  ;;  %v32_v6 = vld [vmem:[%s556_s2 + $0x8] sm:$0xff] }
   0x3   :  { %406 = vmatprep.mubr.msk.f32.mxu0 %vm55_vm1, %v27_v1  ;;  %405 = vmatpush3.msk.msra.mxu0 %vm68_vm0, %v26_v0  ;;  %v33_v7 = vld [vmem:[%s556_s2 + $0x10] sm:$0xff]  ;;  %v30_v8 = vld [vmem:[%s555_s1 + $0x18] sm:$0xff]  ;;  %v31_v9 = vld [vmem:[%s556_s2] sm:$0xff] }
   0x4   :  { %52 = vperm.xlu0 %440, %v34_v5   ;;  %407 = vmatmul.mubr.msk.f32.vlgmr.msra.gmra.mxu0 %vm55_vm1, %v28_v2  ;;  %v168_v10 = vld [vmem:[%s557_s4 + $0x18] sm:$0xff]  ;;  %v167_v11 = vld [vmem:[%s557_s4 + $0x10] sm:$0xff]  ;;  %v166_v12 = vld [vmem:[%s557_s4 + $0x8] sm:$0xff] }
   0x5   :  { %42 = vperm.xlu1 %441, %v32_v6   ;;  %409 = vmatprep.mubr.msk.f32.mxu0 %vm55_vm1, %v29_v4  ;;  %v165_v13 = vld [vmem:[%s557_s4] sm:$0xff]  ;;  %v162_v32 = vld [vmem:[%s559_s3 + $0x8] sm:$0xff]  ;;  %v163_v33 = vld [vmem:[%s559_s3 + $0x10] sm:$0xff] }
   0x6   :  { %v292_v14 = vld [vmem:[%s558_s6] sm:$0x7]  ;;  %v164_v34 = vld [vmem:[%s559_s3 + $0x18] sm:$0xff]  ;;  %426 = vmatprep.subr.mxu0 %v443_v35 }
   0x7   :  { %v161_v15 = vld [vmem:[%s559_s3] sm:$0xff] }
   0x8   :  { %47 = vperm.xlu0 %440, %v33_v7   ;;  %410 = vmatmul.mubr.msk.f32.gmra.mxu0 %vm55_vm1, %v30_v8  ;;  %v291_v52 = vld [vmem:[%s560_s5] sm:$0x7] }
   0x9   :  { %37 = vperm.xlu1 %441, %v31_v9   ;;  %420 = vmatprep.mubr.msk.f32.mxu1 %vm189_vm2, %v161_v15 }
   0xa   :  { %434 = vmatprep.mubr.msk.f32.mxu0 %vm444_vm3, %v443_v35 }
   0xc   :  { %186 = vperm.xlu0 %440, %v168_v10  }
   0xd   :  { %181 = vperm.xlu1 %441, %v167_v11  }
  0x10   :  { %176 = vperm.xlu0 %440, %v166_v12  }
  0x11   :  { %171 = vperm.xlu1 %441, %v165_v13  }
  0x14   :  { %295 = vperm.xlu0 %440, %v292_v14  }
  0x7f   :  { %v53_v16 = vpop.permute.xlu0 %52 }
  0x80   :  { %v43_v18 = vpop.permute.xlu1 %42 }
  0x83   :  { %v48_v22 = vpop.permute.xlu0 %47 }
  0x84   :  { %v38_v27 = vpop.permute.xlu1 %37 }
  0x87   :  { %v187_v36 = vpop.permute.xlu0 %186 }
  0x88   :  { %v182_v38 = vpop.permute.xlu1 %181 }
  0x8b   :  { %v177_v42 = vpop.permute.xlu0 %176 }
  0x8c   :  { %v172_v47 = vpop.permute.xlu1 %171 }
  0x8f   :  { %v296_v53 = vpop.permute.xlu0 %295 }
  0xc4   :  { %v408_v17 = vpop.f32.mrf.mxu0 }
  0xc5   :  { %v144_v24 = vadd.f32 %v408_v17, %v43_v18 }
  0xc6   :  { %v138_v19 = vpop.f32.mrf.mxu0 }
  0xc7   :  { %v139_v28 = vadd.f32 %v138_v19, %v38_v27  ;;  %v158_v30 = vmax.f32 %v144_v24, 0.0 }
  0xc8   :  { %v411_v20 = vpop.f32.mrf.mxu0 }
  0xc9   :  { %v154_v21 = vadd.f32 %v411_v20, %v53_v16  ;;  %v157_v31 = vmax.f32 %v139_v28, 0.0 }
  0xca   :  { %v148_v23 = vpop.f32.mrf.mxu0 }
  0xcb   :  { %v160_v25 = vmax.f32 %v154_v21, 0.0  ;;  %v149_v26 = vadd.f32 %v148_v23, %v48_v22 }
  0xcd   :  { %v159_v29 = vmax.f32 %v149_v26, 0.0  ;;  %412 = vmatprep.subr.mxu1 %v160_v25 }
  0xce   :  { %413 = vmatpush3.msra.mxu1 %v160_v25 }
  0xcf   :  { %414 = vmatprep.subr.mxu1 %v159_v29 }
  0xd0   :  { %415 = vmatpush3.msra.mxu1 %v159_v29 }
  0xd1   :  { %416 = vmatprep.subr.mxu1 %v158_v30 }
  0xd2   :  { %417 = vmatpush3.msra.mxu1 %v158_v30 }
  0xd3   :  { %418 = vmatprep.subr.mxu1 %v157_v31 }
  0xd4   :  { %419 = vmatpush3.msra.mxu1 %v157_v31 }
  0xd5   :  { %421 = vmatmul.mubr.msk.f32.vlgmr.msra.gmra.mxu1 %vm189_vm2, %v162_v32 }
  0xd6   :  { %423 = vmatprep.mubr.msk.f32.mxu1 %vm189_vm2, %v163_v33 }
  0xd9   :  { %424 = vmatmul.mubr.msk.f32.gmra.mxu1 %vm189_vm2, %v164_v34 }
 0x195   :  { %v422_v37 = vpop.f32.mrf.mxu1 }
 0x196   :  { %v274_v44 = vadd.f32 %v422_v37, %v177_v42 }
 0x197   :  { %v268_v39 = vpop.f32.mrf.mxu1 }
 0x198   :  { %v269_v48 = vadd.f32 %v268_v39, %v172_v47  ;;  %v288_v50 = vmax.f32 %v274_v44, 0.0 }
 0x199   :  { %v425_v40 = vpop.f32.mrf.mxu1 }
 0x19a   :  { %v284_v41 = vadd.f32 %v425_v40, %v187_v36  ;;  %v287_v51 = vmax.f32 %v269_v48, 0.0 }
 0x19b   :  { %v278_v43 = vpop.f32.mrf.mxu1 }
 0x19c   :  { %v290_v45 = vmax.f32 %v284_v41, 0.0  ;;  %v279_v46 = vadd.f32 %v278_v43, %v182_v38 }
 0x19e   :  { %v289_v49 = vmax.f32 %v279_v46, 0.0  ;;  %427 = vmatpush3.msra.mxu0 %v290_v45 }
 0x19f   :  { %428 = vmatprep.subr.mxu0 %v443_v35 }
 0x1a0   :  { %429 = vmatpush3.msra.mxu0 %v289_v49 }
 0x1a1   :  { %430 = vmatprep.subr.mxu0 %v443_v35 }
 0x1a2   :  { %431 = vmatpush3.msra.mxu0 %v288_v50 }
 0x1a3   :  { %432 = vmatprep.subr.mxu0 %v443_v35 }
 0x1a4   :  { %433 = vmatpush3.msra.mxu0 %v287_v51 }
 0x1a5   :  { %435 = vmatmul.mubr.msk.f32.vlgmr.msra.gmra.mxu0 %vm189_vm2, %v291_v52 }
 0x265   :  { %v367_v54 = vpop.f32.mrf.mxu0 }
 0x266   :  { %v368_v55 = vadd.f32 %v367_v54, %v296_v53 }
 0x267   :  { %v436_v56 = vpop.f32.mrf.mxu0 }
 0x268   :  { %371 = vst [vmem:[%s561_s7] sm:$0x7] %v368_v55 }

</bundles_post_ra>
